<compile_context>
chip_gen: v5e
topology: v5e:2x2
jax: 0.10.0
libtpu: 0.0.40
codegen_flags: <defaults>
</compile_context>

<pallas_src>
import jax
import jax.numpy as jnp
from jax.experimental import pallas as pl
from jax.experimental.pallas import tpu as pltpu


def _ssl_kernel(t_ref, p_ref, out_ref):
    """One batch block: t_ref (Bt, H, W), p_ref (Bt, 2, H, W), out_ref (8, 128)."""
    t = t_ref[...].astype(jnp.float32)          # (Bt, H, W) target planes
    p = p_ref[...].astype(jnp.float32)          # (Bt, 2, H, W) pred planes
    pt = p[:, 1]                                # pred channel 1 ("true")
    pf = p[:, 0]                                # pred channel 0 ("false")

    _, H, W = t.shape

    # ---- shared edge masks for the 1-D gradients (hoisted, reused 4x) -------
    idx_h = jax.lax.broadcasted_iota(jnp.int32, t.shape, 1)
    idx_w = jax.lax.broadcasted_iota(jnp.int32, t.shape, 2)
    h_first, h_last = idx_h == 0, idx_h == H - 1
    w_first, w_last = idx_w == 0, idx_w == W - 1

    def grad1d(x, axis, n, first, last):
        """torch.gradient (spacing=1, edge_order=1) along `axis`, via XLU rolls."""
        xp = pltpu.roll(x, shift=n - 1, axis=axis)   # x[(i+1) % n]
        xm = pltpu.roll(x, shift=1, axis=axis)       # x[(i-1) % n]
        g = (xp - xm) * 0.5                          # central diff (interior)
        g = jnp.where(first, xp - x, g)              # forward diff at edge 0
        g = jnp.where(last, x - xm, g)               # backward diff at edge n-1
        return g

    gt_lap = (jnp.abs(grad1d(t, 1, H, h_first, h_last))
              + jnp.abs(grad1d(t, 2, W, w_first, w_last)))
    pr_lap = (jnp.abs(grad1d(pt, 1, H, h_first, h_last))
              + jnp.abs(grad1d(pt, 2, W, w_first, w_last)))

    # BCE-with-logits; x = pr_lap >= 0 by construction, so
    # max(x,0) - x*y + log(1+exp(-|x|)) == x*(1-y) + log(1+exp(-x)).
    x, y = pr_lap, gt_lap
    bce = x * (1.0 - y) + jnp.log(1.0 + jnp.exp(-x))

    # ---- per-block partial sums (each reduced to a (1, 1) value) ------------
    def total(v):                                  # (Bt, H, W) -> (1, 1)
        return jnp.sum(jnp.sum(v, axis=0), keepdims=True)

    sum_t = total(t)
    tp = total(t * pt)
    tn = total((1.0 - t) * pf)
    s_abs = total(jnp.abs(pt - t))
    s_bce = total(bce)

    # Pack the 5 partials into sublane rows 0..4 of a full (8, 128) vreg tile
    # so the per-step output store is lane-dense and unmasked.
    sub = jax.lax.broadcasted_iota(jnp.int32, (8, 128), 0)
    tile = jnp.zeros((8, 128), jnp.float32)
    for i, v in enumerate((sum_t, tp, tn, s_abs, s_bce)):
        tile = jnp.where(sub == i, v, tile)
    out_ref[...] = tile


def _pick_block_batch(B, H, W, itemsize, vmem_budget_bytes):
    """Largest divisor of B whose double-buffered footprint fits the budget."""
    per_b = 3 * H * W * itemsize * 2         # 1 target + 2 pred planes, x2 buffers
    max_bt = max(1, vmem_budget_bytes // per_b)
    bt = 1
    for d in range(1, B + 1):
        if B % d == 0 and d <= max_bt:
            bt = d
    return bt


def ssl_loss(target, pred):
    """target: (B, 1, H, W); pred: (B, 2, H, W). Returns the scalar SSLoss."""
    B, Ct, H, W = target.shape
    Bp, Cp, Hp, Wp = pred.shape
    assert Ct == 1 and Cp == 2 and (B, H, W) == (Bp, Hp, Wp)
    assert H > 1 and W > 1, "gradient (edge_order=1) needs >= 2 elems per axis"

    itemsize = max(target.dtype.itemsize, pred.dtype.itemsize)
    bt = _pick_block_batch(B, H, W, itemsize, vmem_budget_bytes=40 * 1024 * 1024)
    nb = B // bt
    n_elems = float(B * H * W)

    partials = pl.pallas_call(
        _ssl_kernel,
        out_shape=jax.ShapeDtypeStruct((nb, 8, 128), jnp.float32),
        grid=(nb,),
        in_specs=[
            # Squeezed channel dim -> kernel sees dense (Bt, H, W) target planes.
            pl.BlockSpec((bt, None, H, W), lambda b: (b, 0, 0, 0)),
            # Single contiguous DMA for both pred channels per step.
            pl.BlockSpec((bt, 2, H, W), lambda b: (b, 0, 0, 0)),
        ],
        out_specs=pl.BlockSpec((None, 8, 128), lambda b: (b, 0, 0)),
        compiler_params=pltpu.CompilerParams(
            dimension_semantics=("parallel",),   # independent per-block partials
            vmem_limit_bytes=48 * 1024 * 1024,   # safe cap on v7x, bump for v5e/v6e
        ),
    )(target, pred)

    # Finalize (~10 flops) in the wrapper; partials live in sublane rows 0..4.
    tot = jnp.sum(partials, axis=0)[:, 0]        # (8,) tree-ordered block sums
    sum_t, tp, tn, s_abs, s_bce = tot[0], tot[1], tot[2], tot[3], tot[4]
    sum_tf = n_elems - sum_t                     # sum(1 - t) without extra reduce
    sens = jnp.clip(1.0 - tp / (sum_t + 0.1), 0.0, 1.0)
    spec = jnp.clip(1.0 - tn / (sum_tf + 0.1), 0.0, 1.0)
    masked_ssl = 0.5 * sens + 0.5 * spec
    return s_abs / n_elems + masked_ssl + s_bce / n_elems


def ssl_loss_ref(target, pred):
    """Pure-JAX reference matching the PyTorch forward exactly."""
    t = target.astype(jnp.float32)
    p_true = pred[:, 1:2, :, :].astype(jnp.float32)
    p_false = pred[:, 0:1, :, :].astype(jnp.float32)

    t_true = t
    t_false = 1.0 - t
    tp = jnp.sum(t_true * p_true)
    tn = jnp.sum(t_false * p_false)
    sens = jnp.clip(1.0 - tp / (jnp.sum(t_true) + 0.1), 0.0, 1.0)
    spec = jnp.clip(1.0 - tn / (jnp.sum(t_false) + 0.1), 0.0, 1.0)
    masked_ssl = 0.5 * sens + 0.5 * spec

    masked_mae = jnp.mean(jnp.abs(p_true - t))

    gt_lap = jnp.abs(jnp.gradient(t, axis=2)) + jnp.abs(jnp.gradient(t, axis=3))
    pr_lap = jnp.abs(jnp.gradient(p_true, axis=2)) + jnp.abs(jnp.gradient(p_true, axis=3))
    x, y = pr_lap, gt_lap
    bce = jnp.mean(jnp.maximum(x, 0.0) - x * y + jnp.log(1.0 + jnp.exp(-jnp.abs(x))))
    return masked_mae + masked_ssl + bce


if __name__ == "__main__":
    key = jax.random.PRNGKey(0)
    k1, k2 = jax.random.split(key)

    # Lane-dense small test shape: W = 128 fills the vector lanes.
    B, H, W = 2, 16, 128
    target = (jax.random.uniform(k1, (B, 1, H, W)) < 0.5).astype(jnp.float32)
    pred = jax.random.normal(k2, (B, 2, H, W), dtype=jnp.float32)

    loss = jax.block_until_ready(ssl_loss(target, pred))
    ref = jax.block_until_ready(ssl_loss_ref(target, pred))

    assert jnp.isfinite(loss), "non-finite loss"
    assert jnp.allclose(loss, ref, rtol=1e-4, atol=1e-5), (loss, ref)
    print("KERNEL_OK")
</pallas_src>

<mosaic_0001>
module attributes {stable_mosaic.version = 11 : i64} {
  func.func @_ssl_kernel(%arg0: i32, %arg1: memref<2x1x16x128xf32, #tpu.memory_space<vmem>>, %arg2: memref<2x2x16x128xf32, #tpu.memory_space<vmem>>, %arg3: memref<1x8x128xf32, #tpu.memory_space<vmem>>) attributes {dimension_semantics = [#tpu.dimension_semantics<parallel>], iteration_bounds = array<i64: 1>, scalar_prefetch = 0 : i64, scratch_operands = 0 : i64, tpu.core_type = #tpu.core_type<tc>, window_params = [{transform_indices = @transform_0, window_bounds = array<i64: 2, 1, 16, 128>}, {transform_indices = @transform_1, window_bounds = array<i64: 2, 2, 16, 128>}, {transform_indices = @transform_2, window_bounds = array<i64: 1, 8, 128>}]} {
    %c0 = arith.constant 0 : index
    %c0_0 = arith.constant 0 : index
    %c0_1 = arith.constant 0 : index
    %c0_2 = arith.constant 0 : index
    %0 = vector.load %arg1[%c0, %c0_0, %c0_1, %c0_2] : memref<2x1x16x128xf32, #tpu.memory_space<vmem>>, vector<2x1x16x128xf32>
    %1 = vector.shape_cast %0 : vector<2x1x16x128xf32> to vector<2x16x128xf32>
    %c0_3 = arith.constant 0 : index
    %c0_4 = arith.constant 0 : index
    %c0_5 = arith.constant 0 : index
    %c0_6 = arith.constant 0 : index
    %2 = vector.load %arg2[%c0_3, %c0_4, %c0_5, %c0_6] : memref<2x2x16x128xf32, #tpu.memory_space<vmem>>, vector<2x2x16x128xf32>
    %3 = vector.extract_strided_slice %2 {offsets = [0, 1, 0, 0], sizes = [2, 1, 16, 128], strides = [1, 1, 1, 1]} : vector<2x2x16x128xf32> to vector<2x1x16x128xf32>
    %4 = vector.shape_cast %3 : vector<2x1x16x128xf32> to vector<2x16x128xf32>
    %5 = vector.extract_strided_slice %2 {offsets = [0, 0, 0, 0], sizes = [2, 1, 16, 128], strides = [1, 1, 1, 1]} : vector<2x2x16x128xf32> to vector<2x1x16x128xf32>
    %6 = vector.shape_cast %5 : vector<2x1x16x128xf32> to vector<2x16x128xf32>
    %7 = tpu.iota {dimensions = array<i32: 1>} : vector<2x16x128xi32>
    %8 = tpu.iota {dimensions = array<i32: 2>} : vector<2x16x128xi32>
    %c0_i32 = arith.constant 0 : i32
    %9 = vector.broadcast %c0_i32 : i32 to vector<2x16x128xi32>
    %10 = arith.cmpi eq, %7, %9 : vector<2x16x128xi32>
    %c15_i32 = arith.constant 15 : i32
    %11 = vector.broadcast %c15_i32 : i32 to vector<2x16x128xi32>
    %12 = arith.cmpi eq, %7, %11 : vector<2x16x128xi32>
    %c0_i32_7 = arith.constant 0 : i32
    %13 = vector.broadcast %c0_i32_7 : i32 to vector<2x16x128xi32>
    %14 = arith.cmpi eq, %8, %13 : vector<2x16x128xi32>
    %c127_i32 = arith.constant 127 : i32
    %15 = vector.broadcast %c127_i32 : i32 to vector<2x16x128xi32>
    %16 = arith.cmpi eq, %8, %15 : vector<2x16x128xi32>
    %c15_i32_8 = arith.constant 15 : i32
    %17 = tpu.dynamic_rotate %1 by %c15_i32_8 dim 1 : vector<2x16x128xf32>, i32 -> vector<2x16x128xf32>
    %c1_i32 = arith.constant 1 : i32
    %18 = tpu.dynamic_rotate %1 by %c1_i32 dim 1 : vector<2x16x128xf32>, i32 -> vector<2x16x128xf32>
    %19 = arith.subf %17, %18 : vector<2x16x128xf32>
    %cst = arith.constant 5.000000e-01 : f32
    %20 = vector.broadcast %cst : f32 to vector<2x16x128xf32>
    %21 = arith.mulf %19, %20 : vector<2x16x128xf32>
    %22 = arith.subf %17, %1 : vector<2x16x128xf32>
    %23 = arith.select %10, %22, %21 : vector<2x16x128xi1>, vector<2x16x128xf32>
    %24 = arith.subf %1, %18 : vector<2x16x128xf32>
    %25 = arith.select %12, %24, %23 : vector<2x16x128xi1>, vector<2x16x128xf32>
    %26 = math.absf %25 : vector<2x16x128xf32>
    %c127_i32_9 = arith.constant 127 : i32
    %27 = tpu.dynamic_rotate %1 by %c127_i32_9 dim 2 : vector<2x16x128xf32>, i32 -> vector<2x16x128xf32>
    %c1_i32_10 = arith.constant 1 : i32
    %28 = tpu.dynamic_rotate %1 by %c1_i32_10 dim 2 : vector<2x16x128xf32>, i32 -> vector<2x16x128xf32>
    %29 = arith.subf %27, %28 : vector<2x16x128xf32>
    %cst_11 = arith.constant 5.000000e-01 : f32
    %30 = vector.broadcast %cst_11 : f32 to vector<2x16x128xf32>
    %31 = arith.mulf %29, %30 : vector<2x16x128xf32>
    %32 = arith.subf %27, %1 : vector<2x16x128xf32>
    %33 = arith.select %14, %32, %31 : vector<2x16x128xi1>, vector<2x16x128xf32>
    %34 = arith.subf %1, %28 : vector<2x16x128xf32>
    %35 = arith.select %16, %34, %33 : vector<2x16x128xi1>, vector<2x16x128xf32>
    %36 = math.absf %35 : vector<2x16x128xf32>
    %37 = arith.addf %26, %36 : vector<2x16x128xf32>
    %c15_i32_12 = arith.constant 15 : i32
    %38 = tpu.dynamic_rotate %4 by %c15_i32_12 dim 1 : vector<2x16x128xf32>, i32 -> vector<2x16x128xf32>
    %c1_i32_13 = arith.constant 1 : i32
    %39 = tpu.dynamic_rotate %4 by %c1_i32_13 dim 1 : vector<2x16x128xf32>, i32 -> vector<2x16x128xf32>
    %40 = arith.subf %38, %39 : vector<2x16x128xf32>
    %cst_14 = arith.constant 5.000000e-01 : f32
    %41 = vector.broadcast %cst_14 : f32 to vector<2x16x128xf32>
    %42 = arith.mulf %40, %41 : vector<2x16x128xf32>
    %43 = arith.subf %38, %4 : vector<2x16x128xf32>
    %44 = arith.select %10, %43, %42 : vector<2x16x128xi1>, vector<2x16x128xf32>
    %45 = arith.subf %4, %39 : vector<2x16x128xf32>
    %46 = arith.select %12, %45, %44 : vector<2x16x128xi1>, vector<2x16x128xf32>
    %47 = math.absf %46 : vector<2x16x128xf32>
    %c127_i32_15 = arith.constant 127 : i32
    %48 = tpu.dynamic_rotate %4 by %c127_i32_15 dim 2 : vector<2x16x128xf32>, i32 -> vector<2x16x128xf32>
    %c1_i32_16 = arith.constant 1 : i32
    %49 = tpu.dynamic_rotate %4 by %c1_i32_16 dim 2 : vector<2x16x128xf32>, i32 -> vector<2x16x128xf32>
    %50 = arith.subf %48, %49 : vector<2x16x128xf32>
    %cst_17 = arith.constant 5.000000e-01 : f32
    %51 = vector.broadcast %cst_17 : f32 to vector<2x16x128xf32>
    %52 = arith.mulf %50, %51 : vector<2x16x128xf32>
    %53 = arith.subf %48, %4 : vector<2x16x128xf32>
    %54 = arith.select %14, %53, %52 : vector<2x16x128xi1>, vector<2x16x128xf32>
    %55 = arith.subf %4, %49 : vector<2x16x128xf32>
    %56 = arith.select %16, %55, %54 : vector<2x16x128xi1>, vector<2x16x128xf32>
    %57 = math.absf %56 : vector<2x16x128xf32>
    %58 = arith.addf %47, %57 : vector<2x16x128xf32>
    %cst_18 = arith.constant 1.000000e+00 : f32
    %59 = vector.broadcast %cst_18 : f32 to vector<2x16x128xf32>
    %60 = arith.subf %59, %37 : vector<2x16x128xf32>
    %61 = arith.mulf %58, %60 : vector<2x16x128xf32>
    %cst_19 = arith.constant 0.000000e+00 : f32
    %62 = vector.broadcast %cst_19 : f32 to vector<2x16x128xf32>
    %63 = arith.subf %62, %58 : vector<2x16x128xf32>
    %64 = math.exp %63 : vector<2x16x128xf32>
    %cst_20 = arith.constant 1.000000e+00 : f32
    %65 = vector.broadcast %cst_20 : f32 to vector<2x16x128xf32>
    %66 = arith.addf %65, %64 : vector<2x16x128xf32>
    %67 = math.log %66 : vector<2x16x128xf32>
    %68 = arith.addf %61, %67 : vector<2x16x128xf32>
    %cst_21 = arith.constant dense<0.000000e+00> : vector<16x128xf32>
    %69 = vector.multi_reduction <add>, %1, %cst_21 [0] : vector<2x16x128xf32> to vector<16x128xf32>
    %70 = vector.shape_cast %69 : vector<16x128xf32> to vector<1x16x128xf32>
    %cst_22 = arith.constant dense<0.000000e+00> : vector<1xf32>
    %71 = vector.multi_reduction <add>, %70, %cst_22 [1, 2] : vector<1x16x128xf32> to vector<1xf32>
    %72 = vector.shape_cast %71 : vector<1xf32> to vector<1x1x1xf32>
    %73 = vector.extract %72[0, 0, 0] : f32 from vector<1x1x1xf32>
    %74 = vector.broadcast %73 : f32 to vector<1x1xf32>
    %75 = arith.mulf %1, %4 : vector<2x16x128xf32>
    %cst_23 = arith.constant dense<0.000000e+00> : vector<16x128xf32>
    %76 = vector.multi_reduction <add>, %75, %cst_23 [0] : vector<2x16x128xf32> to vector<16x128xf32>
    %77 = vector.shape_cast %76 : vector<16x128xf32> to vector<1x16x128xf32>
    %cst_24 = arith.constant dense<0.000000e+00> : vector<1xf32>
    %78 = vector.multi_reduction <add>, %77, %cst_24 [1, 2] : vector<1x16x128xf32> to vector<1xf32>
    %79 = vector.shape_cast %78 : vector<1xf32> to vector<1x1x1xf32>
    %80 = vector.extract %79[0, 0, 0] : f32 from vector<1x1x1xf32>
    %81 = vector.broadcast %80 : f32 to vector<1x1xf32>
    %cst_25 = arith.constant 1.000000e+00 : f32
    %82 = vector.broadcast %cst_25 : f32 to vector<2x16x128xf32>
    %83 = arith.subf %82, %1 : vector<2x16x128xf32>
    %84 = arith.mulf %83, %6 : vector<2x16x128xf32>
    %cst_26 = arith.constant dense<0.000000e+00> : vector<16x128xf32>
    %85 = vector.multi_reduction <add>, %84, %cst_26 [0] : vector<2x16x128xf32> to vector<16x128xf32>
    %86 = vector.shape_cast %85 : vector<16x128xf32> to vector<1x16x128xf32>
    %cst_27 = arith.constant dense<0.000000e+00> : vector<1xf32>
    %87 = vector.multi_reduction <add>, %86, %cst_27 [1, 2] : vector<1x16x128xf32> to vector<1xf32>
    %88 = vector.shape_cast %87 : vector<1xf32> to vector<1x1x1xf32>
    %89 = vector.extract %88[0, 0, 0] : f32 from vector<1x1x1xf32>
    %90 = vector.broadcast %89 : f32 to vector<1x1xf32>
    %91 = arith.subf %4, %1 : vector<2x16x128xf32>
    %92 = math.absf %91 : vector<2x16x128xf32>
    %cst_28 = arith.constant dense<0.000000e+00> : vector<16x128xf32>
    %93 = vector.multi_reduction <add>, %92, %cst_28 [0] : vector<2x16x128xf32> to vector<16x128xf32>
    %94 = vector.shape_cast %93 : vector<16x128xf32> to vector<1x16x128xf32>
    %cst_29 = arith.constant dense<0.000000e+00> : vector<1xf32>
    %95 = vector.multi_reduction <add>, %94, %cst_29 [1, 2] : vector<1x16x128xf32> to vector<1xf32>
    %96 = vector.shape_cast %95 : vector<1xf32> to vector<1x1x1xf32>
    %97 = vector.extract %96[0, 0, 0] : f32 from vector<1x1x1xf32>
    %98 = vector.broadcast %97 : f32 to vector<1x1xf32>
    %cst_30 = arith.constant dense<0.000000e+00> : vector<16x128xf32>
    %99 = vector.multi_reduction <add>, %68, %cst_30 [0] : vector<2x16x128xf32> to vector<16x128xf32>
    %100 = vector.shape_cast %99 : vector<16x128xf32> to vector<1x16x128xf32>
    %cst_31 = arith.constant dense<0.000000e+00> : vector<1xf32>
    %101 = vector.multi_reduction <add>, %100, %cst_31 [1, 2] : vector<1x16x128xf32> to vector<1xf32>
    %102 = vector.shape_cast %101 : vector<1xf32> to vector<1x1x1xf32>
    %103 = vector.extract %102[0, 0, 0] : f32 from vector<1x1x1xf32>
    %104 = vector.broadcast %103 : f32 to vector<1x1xf32>
    %105 = tpu.iota {dimensions = array<i32: 0>} : vector<8x128xi32>
    %cst_32 = arith.constant 0.000000e+00 : f32
    %106 = vector.broadcast %cst_32 : f32 to vector<8x128xf32>
    %c0_i32_33 = arith.constant 0 : i32
    %107 = vector.broadcast %c0_i32_33 : i32 to vector<8x128xi32>
    %108 = arith.cmpi eq, %105, %107 : vector<8x128xi32>
    %109 = vector.shape_cast %74 : vector<1x1xf32> to vector<1x1xf32>
    %110 = vector.broadcast %109 : vector<1x1xf32> to vector<8x128xf32>
    %111 = arith.select %108, %110, %106 : vector<8x128xi1>, vector<8x128xf32>
    %c1_i32_34 = arith.constant 1 : i32
    %112 = vector.broadcast %c1_i32_34 : i32 to vector<8x128xi32>
    %113 = arith.cmpi eq, %105, %112 : vector<8x128xi32>
    %114 = vector.shape_cast %81 : vector<1x1xf32> to vector<1x1xf32>
    %115 = vector.broadcast %114 : vector<1x1xf32> to vector<8x128xf32>
    %116 = arith.select %113, %115, %111 : vector<8x128xi1>, vector<8x128xf32>
    %c2_i32 = arith.constant 2 : i32
    %117 = vector.broadcast %c2_i32 : i32 to vector<8x128xi32>
    %118 = arith.cmpi eq, %105, %117 : vector<8x128xi32>
    %119 = vector.shape_cast %90 : vector<1x1xf32> to vector<1x1xf32>
    %120 = vector.broadcast %119 : vector<1x1xf32> to vector<8x128xf32>
    %121 = arith.select %118, %120, %116 : vector<8x128xi1>, vector<8x128xf32>
    %c3_i32 = arith.constant 3 : i32
    %122 = vector.broadcast %c3_i32 : i32 to vector<8x128xi32>
    %123 = arith.cmpi eq, %105, %122 : vector<8x128xi32>
    %124 = vector.shape_cast %98 : vector<1x1xf32> to vector<1x1xf32>
    %125 = vector.broadcast %124 : vector<1x1xf32> to vector<8x128xf32>
    %126 = arith.select %123, %125, %121 : vector<8x128xi1>, vector<8x128xf32>
    %c4_i32 = arith.constant 4 : i32
    %127 = vector.broadcast %c4_i32 : i32 to vector<8x128xi32>
    %128 = arith.cmpi eq, %105, %127 : vector<8x128xi32>
    %129 = vector.shape_cast %104 : vector<1x1xf32> to vector<1x1xf32>
    %130 = vector.broadcast %129 : vector<1x1xf32> to vector<8x128xf32>
    %131 = arith.select %128, %130, %126 : vector<8x128xi1>, vector<8x128xf32>
    %c0_35 = arith.constant 0 : index
    %c0_36 = arith.constant 0 : index
    %c0_37 = arith.constant 0 : index
    %132 = vector.load %arg3[%c0_35, %c0_36, %c0_37] : memref<1x8x128xf32, #tpu.memory_space<vmem>>, vector<1x8x128xf32>
    %133 = vector.shape_cast %132 : vector<1x8x128xf32> to vector<8x128xf32>
    %134 = vector.shape_cast %131 : vector<8x128xf32> to vector<1x8x128xf32>
    tpu.vector_store %arg3[%c0_35, %c0_36, %c0_37], %134 {strides = array<i32>} : memref<1x8x128xf32, #tpu.memory_space<vmem>>, vector<1x8x128xf32>,
    return
  }
  func.func @transform_0(%arg0: i32) -> (i32, i32, i32, i32) {
    %c0_i32 = arith.constant 0 : i32
    %c0_i32_0 = arith.constant 0 : i32
    %c0_i32_1 = arith.constant 0 : i32
    %c0_i32_2 = arith.constant 0 : i32
    return %arg0, %c0_i32, %c0_i32_0, %c0_i32_1 : i32, i32, i32, i32
  }
  func.func @transform_1(%arg0: i32) -> (i32, i32, i32, i32) {
    %c0_i32 = arith.constant 0 : i32
    %c0_i32_0 = arith.constant 0 : i32
    %c0_i32_1 = arith.constant 0 : i32
    %c0_i32_2 = arith.constant 0 : i32
    return %arg0, %c0_i32, %c0_i32_0, %c0_i32_1 : i32, i32, i32, i32
  }
  func.func @transform_2(%arg0: i32) -> (i32, i32, i32) {
    %c0_i32 = arith.constant 0 : i32
    %c0_i32_0 = arith.constant 0 : i32
    %c0_i32_1 = arith.constant 0 : i32
    return %arg0, %c0_i32, %c0_i32_0 : i32, i32, i32
  }
}

</mosaic_0001>

<bundles_post_ra>
// kernel: tpu_custom_call.1
= control target key start
LH: loop header
LB: loop body
LE: loop exit
PB: predicated region body
PF: predicated region fallthrough
CT: control target
= control target key end

     0   :  { %7 = vsyncpa [#allocation3], 0  ;;  %s833_s0 = inlined_call_operand.hbm [shape: f32[2,1,16,128], index: 0, kind: input, shape index: {}]   ;;  %s834_s1 = inlined_call_operand.hbm [shape: f32[2,2,16,128], index: 1, kind: input, shape index: {}]   ;;  %s835_s2 = inlined_call_operand.hbm [shape: f32[1,8,128], index: 2, kind: output, shape index: {}]  }
   0x1   :  { %8 = vsyncpa [#allocation6], 0 }
   0x2   :  { %9 = vsyncpa [#allocation4], 0  ;;  %s14_s11 = sshll.u32 %s833_s0, 4  ;;  %s513_s12 = smov [#allocation2]   ;;  %s15_s11 = int_to_ptr.hbm [resolvable:$true] %s14_s11 }
   0x3   :  { %s16_s13 = sshll.u32 %s513_s12, 4  ;;  %s27_s16 = sshll.u32 %s834_s1, 4  ;;  %s17_s13 = int_to_ptr.vmem [resolvable:$true] %s16_s13  ;;  %s28_s16 = int_to_ptr.hbm [resolvable:$true] %s27_s16 }
   0x4   :  { %s514_s17 = smov 128   ;;  %s515_s18 = smov 8  }
   0x5   :  { %22 = dma.hbm_to_vmem [thread:$0]  %s15_s11, 512, %s17_s13, [#allocation3], %s514_s17, %s514_s17, %s515_s18  }
   0x6   :  { %s516_s19 = smov [#allocation5]  }
   0x7   :  { %s29_s20 = sshll.u32 %s516_s19, 4  ;;  %s30_s20 = int_to_ptr.vmem [resolvable:$true] %s29_s20 }
   0x8   :  { %35 = dma.hbm_to_vmem [thread:$0]  %s28_s16, 1024, %s30_s20, [#allocation6], %s514_s17, %s514_s17, %s515_s18  }
   0x9   :  { %507 = dma.done.wait [#allocation3], 512  }
   0xa   :  { %508 = vsyncadd [#allocation3], 4294966784 }
   0xb   :  { %509 = dma.done.wait [#allocation6], 1024  }
   0xc   :  { %510 = vsyncadd [#allocation6], 4294966272  ;;  %v541_v0 = vld [vmem:[#allocation5 + $0x30] sm:$0xff]  ;;  %s517_s0 = smov 127   ;;  %s518_s1 = smov 1   ;;  %v548_v2 = vld [vmem:[#allocation5 + $0x38] sm:$0xff]  ;;  %v56_v8 = vlaneseq }
   0xd   :  { %v543_v1 = vld [vmem:[#allocation5 + $0x10] sm:$0xff]  ;;  %209 = vrot.lane.b32.xlu1 %v541_v0, %s517_s0  ;;  %v550_v3 = vld [vmem:[#allocation5 + $0x18] sm:$0xff]  ;;  %v555_v4 = vld [vmem:[#allocation2] sm:$0xff]  ;;  %v164_v17 = vrot.slane %v548_v2, 1  ;;  %v172_v18 = vrot.slane %v548_v2, 7  ;;  %v162_v19 = vrot.slane %v541_v0, 1 }
   0xe   :  { %205 = vrot.lane.b32.xlu0 %v543_v1, %s517_s0  ;;  %213 = vrot.lane.b32.xlu2 %v543_v1, %s518_s1  ;;  %v560_v5 = vld [vmem:[#allocation2 + $0x10] sm:$0xff]  ;;  %v562_v6 = vld [vmem:[#allocation2 + $0x8] sm:$0xff]  ;;  %v564_v7 = vld [vmem:[#allocation2 + $0x18] sm:$0xff]  ;;  %v573_v9 = vshrl.u32 %v56_v8, 7  ;;  %v161_v11 = vrot.slane %v543_v1, 1  ;;  %v163_v12 = vrot.slane %v550_v3, 1  ;;  %v301_v50 = vmul.f32 %v543_v1, %v555_v4 }
   0xf   :  { %v169_v13 = vrot.slane %v543_v1, 7  ;;  %v171_v14 = vrot.slane %v550_v3, 7  ;;  %v170_v20 = vrot.slane %v541_v0, 7  ;;  %v610_v35 = vand.u32 127, %v56_v8  ;;  %s519_s25 = smov [#allocation7]   ;;  %s391_s29 = sshll.u32 %s835_s2, 4  ;;  %s392_s29 = int_to_ptr.hbm [resolvable:$true] %s391_s29 }
  0x10   :  { %vm71_vm0 = vcmp.lt.s32.totalorder %v573_v9, 7  ;;  %vm80_vm1 = vcmp.lt.s32.totalorder %v573_v9, 1  ;;  %vm61_vm2 = vcmp.eq.s32.totalorder %v573_v9, 0  ;;  %v608_v34 = vadd.s32 8, %v573_v9  ;;  %s389_s26 = sshll.u32 %s519_s25, 4  ;;  %s390_s26 = int_to_ptr.vmem [resolvable:$true] %s389_s26 }
  0x11   :  { %v165_v15 = vsel %vm71_vm0, %v161_v11, %v163_v12  ;;  %v175_v16 = vsel %vm80_vm1, %v171_v14, %v169_v13  ;;  %v167_v22 = vsel %vm71_vm0, %v163_v12, %v161_v11  ;;  %v173_v23 = vsel %vm80_vm1, %v169_v13, %v171_v14 }
  0x12   :  { %v177_v21 = vsub.f32 %v165_v15, %v175_v16  ;;  %v168_v24 = vsel %vm71_vm0, %v164_v17, %v162_v19  ;;  %v174_v25 = vsel %vm80_vm1, %v170_v20, %v172_v18  ;;  %v166_v26 = vsel %vm71_vm0, %v162_v19, %v164_v17 }
  0x13   :  { %v176_v27 = vsel %vm80_vm1, %v172_v18, %v170_v20  ;;  %v178_v29 = vsub.f32 %v167_v22, %v173_v23  ;;  %v185_v31 = vsub.f32 %v165_v15, %v543_v1  ;;  %v180_v32 = vsub.f32 %v168_v24, %v174_v25 }
  0x14   :  { %v181_v30 = vmul.f32 0.5, %v177_v21  ;;  %v179_v33 = vsub.f32 %v166_v26, %v176_v27  ;;  %v194_v38 = vsub.f32 %v550_v3, %v173_v23  ;;  %v196_v40 = vsub.f32 %v548_v2, %v174_v25  ;;  %v48_v27 = vld [vmem:[#allocation5] sm:$0xff] }
  0x15   :  { %211 = vrot.lane.b32.xlu1 %v548_v2, %s517_s0  ;;  %v182_v36 = vmul.f32 0.5, %v178_v29  ;;  %v184_v39 = vmul.f32 0.5, %v180_v32  ;;  %v187_v42 = vsub.f32 %v166_v26, %v541_v0  ;;  %vm64_vm3 = vcmp.eq.s32.totalorder %v608_v34, 15 }
  0x16   :  { %207 = vrot.lane.b32.xlu0 %v550_v3, %s517_s0  ;;  %215 = vrot.lane.b32.xlu2 %v550_v3, %s518_s1  ;;  %v614_v37 = vsel %vm61_vm2, %v185_v31, %v181_v30  ;;  %v183_v41 = vmul.f32 0.5, %v179_v33  ;;  %vm65_vm4 = vcmp.eq.s32.totalorder %v610_v35, 0  ;;  %vm66_vm5 = vcmp.eq.s32.totalorder %v610_v35, 127  ;;  %v52_v33 = vld [vmem:[#allocation5 + $0x20] sm:$0xff] }
  0x17   :  { %v201_v46 = vand.u32 2147483647, %v614_v37  ;;  %v630_v48 = vsel %vm64_vm3, %v196_v40, %v184_v39  ;;  %v640_v51 = vsel %vm64_vm3, %v194_v38, %v182_v36  ;;  %v68_v53 = vrot.slane %v560_v5, 1  ;;  %v53_v36 = vld [vmem:[#allocation5 + $0x28] sm:$0xff] }
  0x18   :  { %v634_v49 = vsel %vm61_vm2, %v187_v42, %v183_v41  ;;  %v70_v54 = vrot.slane %v564_v7, 1  ;;  %v302_v55 = vmul.f32 %v550_v3, %v562_v6  ;;  %v77_v56 = vrot.slane %v560_v5, 7 }
  0x19   :  { %v79_v57 = vrot.slane %v564_v7, 7  ;;  %v303_v58 = vmul.f32 %v541_v0, %v560_v5  ;;  %v304_v59 = vmul.f32 %v548_v2, %v564_v7  ;;  %v67_v62 = vrot.slane %v555_v4, 1 }
  0x1a   :  { %v69_v63 = vrot.slane %v562_v6, 1  ;;  %v202_v13 = vand.u32 2147483647, %v640_v51  ;;  %v203_v17 = vand.u32 2147483647, %v634_v49  ;;  %v672_v18 = vsel %vm71_vm0, %v68_v53, %v70_v54 }
  0x1b   :  { %v305_v11 = vadd.f32 %v303_v58, %v301_v50  ;;  %v306_v12 = vadd.f32 %v304_v59, %v302_v55  ;;  %v681_v20 = vsel %vm80_vm1, %v79_v57, %v77_v56  ;;  %v317_v21 = vsub.f32 1.0, %v555_v4 }
  0x1c   :  { %v318_v22 = vsub.f32 1.0, %v562_v6  ;;  %v689_v24 = vsel %vm71_vm0, %v69_v63, %v67_v62  ;;  %v76_v25 = vrot.slane %v555_v4, 7  ;;  %v78_v26 = vrot.slane %v562_v6, 7 }
  0x1d   :  { %219 = vrot.lane.b32.xlu1 %v548_v2, %s518_s1  ;;  %v307_v32 = vadd.f32 %v306_v12, %v305_v11  ;;  %v289_v38 = vadd.f32 %v560_v5, %v555_v4  ;;  %v290_v39 = vadd.f32 %v564_v7, %v562_v6  ;;  %v319_v40 = vsub.f32 1.0, %v560_v5 }
  0x1e   :  { %217 = vrot.lane.b32.xlu0 %v541_v0, %s518_s1  ;;  %113 = vrot.lane.b32.xlu2 %v555_v4, %s517_s0  ;;  %v320_v41 = vsub.f32 1.0, %v564_v7  ;;  %v321_v50 = vmul.f32 %v317_v21, %v48_v27  ;;  %v714_v11 = vsel %vm80_vm1, %v76_v25, %v78_v26  ;;  %v337_v12 = vsub.f32 %v543_v1, %v555_v4 }
  0x1f   :  { %v291_v58 = vadd.f32 %v290_v39, %v289_v38  ;;  %v323_v59 = vmul.f32 %v319_v40, %v52_v33  ;;  %v339_v21 = vsub.f32 %v541_v0, %v560_v5  ;;  %vm371_vm6 = vcmp.eq.s32.totalorder %v573_v9, 1 }
  0x20   :  { %vm374_vm7 = vcmp.eq.s32.totalorder %v573_v9, 2  ;;  %vm377_vm8 = vcmp.eq.s32.totalorder %v573_v9, 3  ;;  %vm380_vm9 = vcmp.eq.s32.totalorder %v573_v9, 4 }
  0x25   :  { %117 = vrot.lane.b32.xlu1 %v560_v5, %s517_s0 }
  0x26   :  { %115 = vrot.lane.b32.xlu0 %v562_v6, %s517_s0  ;;  %119 = vrot.lane.b32.xlu2 %v564_v7, %s517_s0 }
  0x2d   :  { %123 = vrot.lane.b32.xlu1 %v562_v6, %s518_s1 }
  0x2e   :  { %121 = vrot.lane.b32.xlu0 %v555_v4, %s518_s1  ;;  %125 = vrot.lane.b32.xlu2 %v560_v5, %s518_s1 }
  0x36   :  { %127 = vrot.lane.b32.xlu0 %v564_v7, %s518_s1 }
  0x57   :  { %308 = vadd.xlane.f32.xlu2 %v307_v32  ;;  %292 = vadd.xlane.f32.xlu1 %v291_v58  ;;  %v86_v58 = vsub.f32 %v689_v24, %v714_v11 }
  0x59   :  { %v90_v49 = vmul.f32 0.5, %v86_v58 }
  0x68   :  { %v575_v10 = vpop.permute.xlu2 %213 }
  0x69   :  { %v237_v60 = vsub.f32 %v543_v1, %v575_v10 }
  0x70   :  { %v603_v28 = vpop.permute.xlu2 %215 }
  0x71   :  { %v238_v8 = vsub.f32 %v550_v3, %v603_v28 }
  0x78   :  { %v626_v47 = vpop.permute.xlu2 %113 }
  0x7f   :  { %v619_v43 = vpop.permute.xlu1 %209 }
  0x80   :  { %v206_v44 = vpop.permute.xlu0 %205  ;;  %v231_v23 = vsub.f32 %v619_v43, %v541_v0 }
  0x81   :  { %v221_v45 = vsub.f32 %v206_v44, %v575_v10  ;;  %v229_v61 = vsub.f32 %v206_v44, %v543_v1  ;;  %v204_v10 = vand.u32 2147483647, %v630_v48  ;;  %v704_v44 = vpop.permute.xlu2 %119 }
  0x83   :  { %v225_v52 = vmul.f32 0.5, %v221_v45  ;;  %v708_v45 = vsel %vm71_vm0, %v67_v62, %v69_v63  ;;  %v338_v62 = vsub.f32 %v550_v3, %v562_v6 }
  0x85   :  { %v233_v14 = vsel %vm65_vm4, %v229_v61, %v225_v52 }
  0x86   :  { %v241_v29 = vsel %vm66_vm5, %v237_v60, %v233_v14  ;;  %v324_v60 = vmul.f32 %v320_v41, %v53_v36  ;;  %v343_v36 = vand.u32 2147483647, %v339_v21 }
  0x87   :  { %v662_v15 = vpop.permute.xlu1 %211  ;;  %v245_v61 = vand.u32 2147483647, %v241_v29 }
  0x88   :  { %v208_v16 = vpop.permute.xlu0 %207 }
  0x89   :  { %v222_v19 = vsub.f32 %v208_v16, %v603_v28  ;;  %v49_v28 = vld [vmem:[#allocation5 + $0x8] sm:$0xff]  ;;  %v230_v31 = vsub.f32 %v208_v16, %v550_v3  ;;  %v340_v3 = vsub.f32 %v548_v2, %v564_v7  ;;  %v731_v38 = vadd.f32 %v245_v61, %v201_v46 }
  0x8a   :  { %v322_v52 = vmul.f32 %v318_v22, %v49_v28  ;;  %v232_v22 = vsub.f32 %v662_v15, %v548_v2 }
  0x8b   :  { %v226_v30 = vmul.f32 0.5, %v222_v19  ;;  %v325_v19 = vadd.f32 %v323_v59, %v321_v50  ;;  %v261_v46 = vsub.f32 0.0, %v731_v38  ;;  %v87_v50 = vsub.f32 %v672_v18, %v681_v20 }
  0x8c   :  { %v95_v20 = vsub.f32 %v672_v18, %v560_v5 }
  0x8d   :  { %v234_v42 = vsel %vm65_vm4, %v230_v31, %v226_v30  ;;  %v341_v30 = vand.u32 2147483647, %v337_v12  ;;  %v342_v31 = vand.u32 2147483647, %v338_v62  ;;  %v265_v62 = vmul.f32 1.442695, %v261_v46 }
  0x8e   :  { %v242_v55 = vsel %vm66_vm5, %v238_v8, %v234_v42  ;;  %v326_v8 = vadd.f32 %v324_v60, %v322_v52  ;;  %v126_v52 = vpop.permute.xlu2 %125 }
  0x8f   :  { %v246_v63 = vand.u32 2147483647, %v242_v55  ;;  %v220_v14 = vpop.permute.xlu1 %219  ;;  %v345_v37 = vadd.f32 %v343_v36, %v341_v30  ;;  %419 = vpow2.f32 %v265_v62  ;;  %v137_v30 = vsub.f32 %v626_v47, %v555_v4 }
  0x90   :  { %v218_v16 = vpop.permute.xlu0 %217  ;;  %v224_v27 = vsub.f32 %v662_v15, %v220_v14  ;;  %v240_v28 = vsub.f32 %v548_v2, %v220_v14  ;;  %v327_v29 = vadd.f32 %v326_v8, %v325_v19  ;;  %v83_v15 = vsel %vm80_vm1, %v78_v26, %v76_v25 }
  0x91   :  { %v223_v1 = vsub.f32 %v619_v43, %v218_v16  ;;  %v239_v39 = vsub.f32 %v541_v0, %v218_v16  ;;  %v344_v43 = vand.u32 2147483647, %v340_v3  ;;  %v738_v40 = vadd.f32 %v246_v63, %v202_v13 }
  0x92   :  { %v228_v32 = vmul.f32 0.5, %v224_v27  ;;  %328 = vadd.xlane.f32.xlu0 %v327_v29  ;;  %v85_v12 = vsub.f32 %v708_v45, %v83_v15  ;;  %v93_v8 = vsub.f32 %v708_v45, %v555_v4  ;;  %v147_v27 = vsub.f32 %v560_v5, %v126_v52 }
  0x93   :  { %v227_v33 = vmul.f32 0.5, %v223_v1  ;;  %v346_v26 = vadd.f32 %v344_v43, %v342_v31  ;;  %v262_v51 = vsub.f32 0.0, %v738_v40  ;;  %v82_v45 = vsel %vm80_vm1, %v77_v56, %v79_v57 }
  0x94   :  { %v236_v2 = vsel %vm65_vm4, %v232_v22, %v228_v32  ;;  %v89_v22 = vmul.f32 0.5, %v85_v12 }
  0x95   :  { %v235_v41 = vsel %vm65_vm4, %v231_v23, %v227_v33  ;;  %v244_v0 = vsel %vm66_vm5, %v240_v28, %v236_v2  ;;  %v347_v59 = vadd.f32 %v346_v26, %v345_v37  ;;  %v267_v14 = vmul.f32 1.442695, %v262_v51  ;;  %v420_v33 = vpop.eup %419 }
  0x96   :  { %v243_v25 = vsel %vm66_vm5, %v239_v39, %v235_v41  ;;  %v248_v13 = vand.u32 2147483647, %v244_v0  ;;  %v75_v28 = vsel %vm71_vm0, %v70_v54, %v68_v53  ;;  %v104_v0 = vsub.f32 %v564_v7, %v82_v45 }
  0x97   :  { %v247_v42 = vand.u32 2147483647, %v243_v25  ;;  %v118_v55 = vpop.permute.xlu1 %117  ;;  %348 = vadd.xlane.f32.xlu2 %v347_v59  ;;  %421 = vpow2.f32 %v267_v14  ;;  %v88_v57 = vsub.f32 %v75_v28, %v82_v45 }
  0x98   :  { %v116_v23 = vpop.permute.xlu0 %115  ;;  %v756_v60 = vadd.f32 %v248_v13, %v204_v10  ;;  %v131_v63 = vsub.f32 %v118_v55, %v126_v52  ;;  %v139_v48 = vsub.f32 %v118_v55, %v560_v5  ;;  %v91_v10 = vmul.f32 0.5, %v87_v50 }
  0x99   :  { %v760_v61 = vadd.f32 %v247_v42, %v203_v17  ;;  %v102_v17 = vsub.f32 %v562_v6, %v714_v11  ;;  %v97_v5 = vsel %vm61_vm2, %v93_v8, %v89_v22  ;;  %v138_v36 = vsub.f32 %v116_v23, %v562_v6 }
  0x9a   :  { %v264_v24 = vsub.f32 0.0, %v756_v60  ;;  %v135_v19 = vmul.f32 0.5, %v131_v63  ;;  %v99_v1 = vsel %vm61_vm2, %v95_v20, %v91_v10  ;;  %v109_v37 = vand.u32 2147483647, %v97_v5 }
  0x9b   :  { %v263_v16 = vsub.f32 0.0, %v760_v61  ;;  %v106_v3 = vsel %vm64_vm3, %v102_v17, %v90_v49  ;;  %v111_v39 = vand.u32 2147483647, %v99_v1  ;;  %v92_v13 = vmul.f32 0.5, %v88_v57 }
  0x9c   :  { %v271_v21 = vmul.f32 1.442695, %v264_v24  ;;  %v143_v11 = vsel %vm65_vm4, %v139_v48, %v135_v19  ;;  %v110_v41 = vand.u32 2147483647, %v106_v3  ;;  %v273_v52 = vadd.f32 1.0, %v420_v33 }
  0x9d   :  { %v269_v18 = vmul.f32 1.442695, %v263_v16  ;;  %v151_v31 = vsel %vm66_vm5, %v147_v27, %v143_v11  ;;  %v422_v2 = vpop.eup %421  ;;  %v140_v20 = vsub.f32 %v704_v44, %v564_v7  ;;  %v108_v14 = vsel %vm64_vm3, %v104_v0, %v92_v13 }
  0x9e   :  { %v274_v58 = vadd.f32 1.0, %v422_v2  ;;  %v112_v19 = vand.u32 2147483647, %v108_v14 }
  0x9f   :  { %423 = vpow2.f32 %v269_v18  ;;  %v124_v29 = vpop.permute.xlu1 %123 }
  0xa0   :  { %v122_v53 = vpop.permute.xlu0 %121  ;;  %425 = vpow2.f32 %v271_v21  ;;  %v130_v54 = vsub.f32 %v116_v23, %v124_v29  ;;  %v146_v32 = vsub.f32 %v562_v6, %v124_v29 }
  0xa1   :  { %v129_v56 = vsub.f32 %v626_v47, %v122_v53  ;;  %v145_v46 = vsub.f32 %v555_v4, %v122_v53  ;;  %v155_v47 = vand.u32 2147483647, %v151_v31 }
  0xa2   :  { %v134_v15 = vmul.f32 0.5, %v130_v54 }
  0xa3   :  { %v133_v43 = vmul.f32 0.5, %v129_v56  ;;  %v159_v63 = vadd.f32 %v155_v47, %v111_v39 }
  0xa4   :  { %v142_v26 = vsel %vm65_vm4, %v138_v36, %v134_v15 }
  0xa5   :  { %v424_v25 = vpop.eup %423  ;;  %v141_v51 = vsel %vm65_vm4, %v137_v30, %v133_v43  ;;  %v150_v42 = vsel %vm66_vm5, %v146_v32, %v142_v26  ;;  %v255_v8 = vsub.f32 1.0, %v159_v63 }
  0xa6   :  { %v426_v6 = vpop.eup %425  ;;  %v149_v50 = vsel %vm66_vm5, %v145_v46, %v141_v51  ;;  %v275_v4 = vadd.f32 1.0, %v424_v25  ;;  %v154_v55 = vand.u32 2147483647, %v150_v42 }
  0xa7   :  { %v153_v23 = vand.u32 2147483647, %v149_v50  ;;  %v276_v12 = vadd.f32 1.0, %v426_v6  ;;  %v259_v3 = vmul.f32 %v255_v8, %v760_v61 }
  0xa8   :  { %v128_v59 = vpop.permute.xlu0 %127  ;;  %427 = vlog2.f32 %v275_v4  ;;  %v158_v24 = vadd.f32 %v154_v55, %v110_v41 }
  0xa9   :  { %v132_v62 = vsub.f32 %v704_v44, %v128_v59  ;;  %429 = vlog2.f32 %v273_v52  ;;  %v157_v16 = vadd.f32 %v153_v23, %v109_v37  ;;  %v148_v10 = vsub.f32 %v564_v7, %v128_v59 }
  0xaa   :  { %431 = vlog2.f32 %v274_v58  ;;  %v254_v21 = vsub.f32 1.0, %v158_v24 }
  0xab   :  { %v136_v48 = vmul.f32 0.5, %v132_v62  ;;  %433 = vlog2.f32 %v276_v12  ;;  %v253_v34 = vsub.f32 1.0, %v157_v16 }
  0xac   :  { %v258_v29 = vmul.f32 %v254_v21, %v738_v40 }
  0xad   :  { %v144_v49 = vsel %vm65_vm4, %v140_v20, %v136_v48  ;;  %v257_v7 = vmul.f32 %v253_v34, %v731_v38 }
  0xae   :  { %v428_v17 = vpop.eup %427  ;;  %v152_v44 = vsel %vm66_vm5, %v148_v10, %v144_v49 }
  0xaf   :  { %v156_v18 = vand.u32 2147483647, %v152_v44  ;;  %v430_v22 = vpop.eup %429  ;;  %v282_v45 = vmul.f32 0.6931472, %v428_v17 }
  0xb0   :  { %v432_v27 = vpop.eup %431  ;;  %v278_v53 = vmul.f32 0.6931472, %v430_v22 }
  0xb1   :  { %v160_v28 = vadd.f32 %v156_v18, %v112_v19  ;;  %v434_v11 = vpop.eup %433  ;;  %v280_v54 = vmul.f32 0.6931472, %v432_v27  ;;  %v287_v56 = vadd.f32 %v282_v45, %v259_v3 }
  0xb2   :  { %v284_v5 = vmul.f32 0.6931472, %v434_v11  ;;  %v285_v57 = vadd.f32 %v278_v53, %v257_v7 }
  0xb3   :  { %v256_v1 = vsub.f32 1.0, %v160_v28  ;;  %v286_v30 = vadd.f32 %v280_v54, %v258_v29 }
  0xb4   :  { %v357_v32 = vadd.f32 %v287_v56, %v285_v57 }
  0xb5   :  { %v260_v35 = vmul.f32 %v256_v1, %v756_v60 }
  0xb7   :  { %v288_v31 = vadd.f32 %v284_v5, %v260_v35 }
  0xb9   :  { %v358_v33 = vadd.f32 %v288_v31, %v286_v30 }
  0xbb   :  { %v359_v36 = vadd.f32 %v358_v33, %v357_v32 }
  0xbd   :  { %360 = vadd.xlane.f32.xlu1 %v359_v36 }
  0xca   :  { %v309_v39 = vpop.xlane.xlu2 %308  ;;  %v293_v43 = vpop.xlane.xlu1 %292 }
  0xcb   :  { %v310_v15 = vrot.slane %v309_v39, 4  ;;  %v294_v40 = vrot.slane %v293_v43, 4 }
  0xcd   :  { %v311_v38 = vadd.f32 %v310_v15, %v309_v39  ;;  %v295_v61 = vadd.f32 %v294_v40, %v293_v43 }
  0xcf   :  { %v312_v2 = vrot.slane %v311_v38, 2  ;;  %v296_v60 = vrot.slane %v295_v61, 2 }
  0xd1   :  { %v313_v37 = vadd.f32 %v312_v2, %v311_v38  ;;  %v297_v47 = vadd.f32 %v296_v60, %v295_v61 }
  0xd3   :  { %v314_v0 = vrot.slane %v313_v37, 1  ;;  %v298_v51 = vrot.slane %v297_v47, 1 }
  0xd5   :  { %v315_v6 = vadd.f32 %v314_v0, %v313_v37  ;;  %v299_v52 = vadd.f32 %v298_v51, %v297_v47 }
  0xd7   :  { %402 = vpush %v299_v52 }
  0xd8   :  { %404 = vpush %v315_v6 }
 0x105   :  { %v329_v41 = vpop.xlane.xlu0 %328 }
 0x106   :  { %v330_v46 = vrot.slane %v329_v41, 4 }
 0x108   :  { %v331_v25 = vadd.f32 %v330_v46, %v329_v41  ;;  %s403_s21 = spop %402 }
 0x109   :  { %v369_v19 = vstv %s403_s21  ;;  %s405_s22 = spop %404 }
 0x10a   :  { %v332_v26 = vrot.slane %v331_v25, 2  ;;  %v349_v13 = vpop.xlane.xlu2 %348  ;;  %v370_v49 = vsel %vm61_vm2, %v369_v19, 0.0  ;;  %v372_v17 = vstv %s405_s22 }
 0x10b   :  { %v350_v50 = vrot.slane %v349_v13, 4  ;;  %v373_v44 = vsel %vm371_vm6, %v372_v17, %v370_v49 }
 0x10c   :  { %v333_v42 = vadd.f32 %v332_v26, %v331_v25 }
 0x10d   :  { %v351_v4 = vadd.f32 %v350_v50, %v349_v13 }
 0x10e   :  { %v334_v55 = vrot.slane %v333_v42, 1 }
 0x10f   :  { %v352_v23 = vrot.slane %v351_v4, 2 }
 0x110   :  { %v335_v58 = vadd.f32 %v334_v55, %v333_v42 }
 0x111   :  { %v353_v59 = vadd.f32 %v352_v23, %v351_v4 }
 0x112   :  { %406 = vpush %v335_v58 }
 0x113   :  { %v354_v12 = vrot.slane %v353_v59, 1 }
 0x115   :  { %v355_v62 = vadd.f32 %v354_v12, %v353_v59 }
 0x117   :  { %408 = vpush %v355_v62 }
 0x130   :  { %v361_v20 = vpop.xlane.xlu1 %360 }
 0x131   :  { %v362_v63 = vrot.slane %v361_v20, 4 }
 0x133   :  { %v363_v14 = vadd.f32 %v362_v63, %v361_v20 }
 0x135   :  { %v364_v24 = vrot.slane %v363_v14, 2 }
 0x137   :  { %v365_v16 = vadd.f32 %v364_v24, %v363_v14 }
 0x139   :  { %v366_v48 = vrot.slane %v365_v16, 1 }
 0x13b   :  { %v367_v10 = vadd.f32 %v366_v48, %v365_v16 }
 0x13d   :  { %410 = vpush %v367_v10 }
 0x143   :  { %s407_s23 = spop %406 }
 0x144   :  { %v375_v8 = vstv %s407_s23 }
 0x145   :  { %v376_v21 = vsel %vm374_vm7, %v375_v8, %v373_v44 }
 0x148   :  { %s409_s24 = spop %408 }
 0x149   :  { %v378_v34 = vstv %s409_s24 }
 0x14a   :  { %v379_v18 = vsel %vm377_vm8, %v378_v34, %v376_v21 }
 0x16e   :  { %s411_s30 = spop %410 }
 0x16f   :  { %v381_v22 = vstv %s411_s30 }
 0x170   :  { %v382_v27 = vsel %vm380_vm9, %v381_v22, %v379_v18 }
 0x171   :  { %383 = vst [vmem:[#allocation7] sm:$0xff] %v382_v27 }
 0x172   :  { %394 = dma.vmem_to_hbm [thread:$0]  %s390_s26, 128, %s392_s29, [#allocation4]  }
 0x173   :  { %511 = dma.done.wait [#allocation4], 128  }
 0x174   :  { %512 = vsyncadd [#allocation4], 4294967168 }
 0x175   :  { %399 = vsyncpa [#allocation3], 1 }
 0x176   :  { %400 = vsyncpa [#allocation6], 1 }
 0x177   :  { %401 = vsyncpa [#allocation4], 1 }

</bundles_post_ra>
